<compile_context>
chip_gen: v5e
topology: v5e:2x2
jax: 0.10.0
libtpu: 0.0.40
codegen_flags: <defaults>
</compile_context>

<pallas_src>
import math

import jax
import jax.numpy as jnp
from jax.experimental import pallas as pl
from jax.experimental.pallas import tpu as pltpu


def _copy_kernel(x_ref, o_ref):
    # Straight VMEM tile copy (the reshape itself has no arithmetic).
    o_ref[...] = x_ref[...]


def unflatten(x: jax.Array, *, target_block_bytes: int = 4 * 1024 * 1024) -> jax.Array:
    """Pallas equivalent of Unflatten.forward: x.view(N, -1, 1, 1)."""
    n = x.shape[0]
    flat = math.prod(x.shape[1:]) if x.ndim > 1 else 1
    total = n * flat
    itemsize = jnp.dtype(x.dtype).itemsize

    # --- contiguous 2D view (rows, width) of the row-major flat data --------
    # Prefer a wide lane dim (multiple of 128): unmasked vst + one big linear
    # DMA per block.
    width = None
    for cand in (8192, 4096, 2048, 1024, 512, 256, 128):
        if total % cand == 0:
            width = cand
            break
    if width is not None:
        rows = total // width
    else:
        # Flattened size not a multiple of 128: tile over the batch axis and
        # keep the full flattened extent as the lane axis (full-dim => legal).
        rows, width = n, flat

    x2d = x.reshape(rows, width)  # metadata-only

    # --- row tile so each block is ~target_block_bytes ----------------------
    row_bytes = width * itemsize
    max_rows = max(1, target_block_bytes // row_bytes)
    if rows <= max_rows:
        row_tile = rows  # full extent -> always a legal block dim
    else:
        row_tile = max(8, (max_rows // 8) * 8)  # multiple of 8 (sublane rule)
    grid = (pl.cdiv(rows, row_tile),)

    block_bytes = row_tile * row_bytes
    # in + out, double-buffered, plus slack. 32 MiB default is safe on
    # v5e/v6e (128 MiB physical) and v7x (64 MiB physical).
    vmem_limit = max(32 * 1024 * 1024, 4 * block_bytes + 2 * 1024 * 1024)

    y2d = pl.pallas_call(
        _copy_kernel,
        out_shape=jax.ShapeDtypeStruct((rows, width), x.dtype),
        grid=grid,
        in_specs=[pl.BlockSpec((row_tile, width), lambda i: (i, 0))],
        out_specs=pl.BlockSpec((row_tile, width), lambda i: (i, 0)),
        # Donate the (intermediate) input buffer: no second HBM allocation
        # for what is logically a metadata reshape.
        input_output_aliases={0: 0},
        compiler_params=pltpu.CompilerParams(
            dimension_semantics=("parallel",),
            vmem_limit_bytes=vmem_limit,
        ),
        cost_estimate=pl.CostEstimate(
            flops=0,
            transcendentals=0,
            bytes_accessed=2 * total * itemsize,
        ),
    )(x2d)

    return y2d.reshape(n, flat, 1, 1)  # metadata-only


if __name__ == "__main__":
    key = jax.random.PRNGKey(0)

    # Small NCHW input consistent with the module's usage.
    x = jax.random.normal(key, (2, 4, 16, 16), dtype=jnp.float32)
    y = unflatten(x)
    jax.block_until_ready(y)

    ref = x.reshape(x.shape[0], -1, 1, 1)
    assert y.shape == (2, 4 * 16 * 16, 1, 1), y.shape
    assert y.dtype == x.dtype
    assert jnp.array_equal(y, ref), "mismatch vs reference reshape"

    # Exercise the fallback path (flattened size not a multiple of 128).
    x_odd = jax.random.normal(jax.random.PRNGKey(1), (2, 3, 5, 7), dtype=jnp.float32)
    y_odd = unflatten(x_odd)
    jax.block_until_ready(y_odd)
    assert y_odd.shape == (2, 3 * 5 * 7, 1, 1), y_odd.shape
    assert jnp.array_equal(y_odd, x_odd.reshape(2, -1, 1, 1)), "fallback mismatch"

    print("KERNEL_OK")
</pallas_src>

<mosaic_0001>
module attributes {stable_mosaic.version = 11 : i64} {
  func.func @_copy_kernel(%arg0: i32, %arg1: memref<1x2048xf32, #tpu.memory_space<vmem>>, %arg2: memref<1x2048xf32, #tpu.memory_space<vmem>>) attributes {dimension_semantics = [#tpu.dimension_semantics<parallel>], iteration_bounds = array<i64: 1>, scalar_prefetch = 0 : i64, scratch_operands = 0 : i64, tpu.core_type = #tpu.core_type<tc>, window_params = [{transform_indices = @transform_0, window_bounds = array<i64: 1, 2048>}, {transform_indices = @transform_1, window_bounds = array<i64: 1, 2048>}]} {
    %c0 = arith.constant 0 : index
    %c0_0 = arith.constant 0 : index
    %0 = vector.load %arg1[%c0, %c0_0] : memref<1x2048xf32, #tpu.memory_space<vmem>>, vector<1x2048xf32>
    %c0_1 = arith.constant 0 : index
    %c0_2 = arith.constant 0 : index
    %1 = vector.load %arg2[%c0_1, %c0_2] : memref<1x2048xf32, #tpu.memory_space<vmem>>, vector<1x2048xf32>
    tpu.vector_store %arg2[%c0_1, %c0_2], %0 {strides = array<i32>} : memref<1x2048xf32, #tpu.memory_space<vmem>>, vector<1x2048xf32>,
    return
  }
  func.func @transform_0(%arg0: i32) -> (i32, i32) {
    %c0_i32 = arith.constant 0 : i32
    %c0_i32_0 = arith.constant 0 : i32
    return %arg0, %c0_i32 : i32, i32
  }
  func.func @transform_1(%arg0: i32) -> (i32, i32) {
    %c0_i32 = arith.constant 0 : i32
    %c0_i32_0 = arith.constant 0 : i32
    return %arg0, %c0_i32 : i32, i32
  }
}

</mosaic_0001>

<bundles_post_ra>
// kernel: tpu_custom_call.1
= control target key start
LH: loop header
LB: loop body
LE: loop exit
PB: predicated region body
PF: predicated region fallthrough
CT: control target
= control target key end

     0   :  { %6 = vsyncpa [#allocation3], 0  ;;  %s116_s0 = inlined_call_operand.hbm [shape: f32[1,2048], index: 0, kind: input, shape index: {}, may-alias: {0,1}]   ;;  %s117_s1 = inlined_call_operand.hbm [shape: f32[1,2048], index: 1, kind: output, shape index: {}, may-alias: {0,1}]  }
   0x1   :  { %7 = vsyncpa [#allocation4], 0  ;;  %s13_s8 = sshll.u32 %s116_s0, 4  ;;  %s98_s9 = smov [#allocation2]   ;;  %s14_s8 = int_to_ptr.hbm [resolvable:$true] %s13_s8 }
   0x2   :  { %s15_s10 = sshll.u32 %s98_s9, 4  ;;  %s16_s10 = int_to_ptr.vmem [resolvable:$true] %s15_s10 }
   0x3   :  { %18 = dma.hbm_to_vmem [thread:$0]  %s14_s8, 256, %s16_s10, [#allocation3]  }
   0x4   :  { %94 = dma.done.wait [#allocation3], 256  }
   0x5   :  { %95 = vsyncadd [#allocation3], 4294967040  ;;  %s99_s11 = smov [#allocation5]   ;;  %s34_s15 = sshll.u32 %s117_s1, 4  ;;  %v23_v0 = vld [vmem:[#allocation2] sm:$0xff]  ;;  %v24_v1 = vld [vmem:[#allocation2 + $0x8] sm:$0xff]  ;;  %s35_s15 = int_to_ptr.hbm [resolvable:$true] %s34_s15 }
   0x6   :  { %s32_s12 = sshll.u32 %s99_s11, 4  ;;  %25 = vst [vmem:[#allocation5] sm:$0xff] %v23_v0  ;;  %s33_s12 = int_to_ptr.vmem [resolvable:$true] %s32_s12 }
   0x7   :  { %26 = vst [vmem:[#allocation5 + $0x8] sm:$0xff] %v24_v1 }
   0x8   :  { %37 = dma.vmem_to_hbm [thread:$0]  %s33_s12, 256, %s35_s15, [#allocation4]  }
   0x9   :  { %96 = dma.done.wait [#allocation4], 256  }
   0xa   :  { %97 = vsyncadd [#allocation4], 4294967040 }
   0xb   :  { %42 = vsyncpa [#allocation3], 1 }
   0xc   :  { %43 = vsyncpa [#allocation4], 1 }

</bundles_post_ra>
